<compile_context>
chip_gen: v7x
topology: tpu7x:2x2x1
jax: 0.10.0
libtpu: 0.0.40
codegen_flags: <defaults>
</compile_context>

<pallas_src>
import jax
import jax.numpy as jnp
from jax.experimental import pallas as pl
from jax.experimental.pallas import tpu as pltpu

_EPS = 1e-8


def _round_up(x, m):
    return (x + m - 1) // m * m


def _default_core_splits():
    """2 for chips exposing two TensorCores per JAX device (v4/v5p/v7x), else 1."""
    try:
        kind = jax.local_devices()[0].device_kind.lower()
    except Exception:
        return 1
    if "lite" in kind:  # v4i / "v5 lite" (v5e) / "v6 lite" (v6e): single TC
        return 1
    for tag in ("v7", "v5p", "v4"):
        if tag in kind:
            return 2
    return 1


def _partials_kernel(yh_ref, yt_ref, sq_ref, cos_ref):
    """Accumulate per-sample partial sums for one (D, TB) batch tile.

    yh_ref / yt_ref : (D, TB)    feature rows (sublanes) x batch samples (lanes)
    sq_ref          : (1, 1, TB) running sum over rows 0:3 of (yh - yt)^2
    cos_ref         : (1, 1, TB) running per-sample cosine similarity
    """
    i = pl.program_id(1)  # accumulation ("arbitrary") axis

    @pl.when(i == 0)
    def _init():
        sq_ref[...] = jnp.zeros_like(sq_ref)
        cos_ref[...] = jnp.zeros_like(cos_ref)

    d = yh_ref.shape[0]

    # --- translational squared error: static sublane slice rows 0:3 ---
    dt = (yh_ref[pl.ds(0, 3), :].astype(jnp.float32)
          - yt_ref[pl.ds(0, 3), :].astype(jnp.float32))          # (3, TB)
    sq = jnp.sum(dt * dt, axis=0, keepdims=True)                 # (1, TB)

    # --- angular cosine similarity: static sublane slice rows 3: ---
    a = yh_ref[pl.ds(3, d - 3), :].astype(jnp.float32)           # (D-3, TB)
    b = yt_ref[pl.ds(3, d - 3), :].astype(jnp.float32)
    dot = jnp.sum(a * b, axis=0, keepdims=True)                  # (1, TB)
    sa = jnp.sum(a * a, axis=0, keepdims=True)
    sb = jnp.sum(b * b, axis=0, keepdims=True)
    eps2 = jnp.float32(_EPS * _EPS)
    # dot * rsqrt(max(sa,eps^2)*max(sb,eps^2)) == dot / (max(|a|,eps)*max(|b|,eps))
    cos = dot * jax.lax.rsqrt(jnp.maximum(sa, eps2) * jnp.maximum(sb, eps2))

    sq_ref[...] = sq_ref[...] + sq.reshape(sq_ref.shape)
    cos_ref[...] = cos_ref[...] + cos.reshape(cos_ref.shape)


def pos_and_angle_loss(y_hat, y, *, block_b=65536, core_splits=None,
                       min_pallas_batch=4096):
    """y_hat, y: (B, D) arrays with D >= 4. Returns scalar float32 loss."""
    assert y_hat.shape == y.shape and y_hat.ndim == 2 and y_hat.shape[1] >= 4
    B, D = y_hat.shape

    # Small-batch fast path: a single XLA fusion beats the transpose + Pallas
    # launch when the whole problem is a few microseconds of work.
    if B < min_pallas_batch:
        return _reference_loss(y_hat, y)

    cd = core_splits if core_splits is not None else _default_core_splits()
    cd = max(1, int(cd))

    # Adaptive batch tile (lane axis), 128-aligned, padding waste < cd*nb*128.
    tb_max = max(128, min(_round_up(block_b, 128), 131072))
    per_core = -(-B // cd)                      # ceil(B / cores)
    nb = max(1, -(-per_core // tb_max))         # accumulation steps per core
    tb = _round_up(-(-per_core // nb), 128)     # even spread over steps
    bp = cd * nb * tb                           # padded batch size

    # Layout plumbing: batch on the lane axis, zero-pad.  allow_input_fusion
    # lets XLA fuse this transpose/pad into the pallas_call operand stream
    # instead of materializing a second copy in HBM.  Padded samples contribute
    # exactly 0 to both partial sums (diff = 0; dot = 0 => cos = 0).
    yh_t = jnp.pad(y_hat.T, ((0, 0), (0, bp - B)))
    yt_t = jnp.pad(y.T, ((0, 0), (0, bp - B)))

    # VMEM budget: 2 inputs x 2 buffers x (Dpad, tb) + 2 outputs x 2 x (8, tb).
    dpad = _round_up(D, 8)
    vmem_needed = 4 * tb * (2 * 2 * dpad + 2 * 2 * 8) + (2 << 20)
    vmem_limit = int(min(max(vmem_needed, 32 << 20), 56 << 20))

    out_sq, out_cos = pl.pallas_call(
        _partials_kernel,
        grid=(cd, nb),
        in_specs=[
            pl.BlockSpec((D, tb), lambda c, i: (0, c * nb + i)),
            pl.BlockSpec((D, tb), lambda c, i: (0, c * nb + i)),
        ],
        out_specs=[
            pl.BlockSpec((1, 1, tb), lambda c, i: (c, 0, 0)),
            pl.BlockSpec((1, 1, tb), lambda c, i: (c, 0, 0)),
        ],
        out_shape=[
            jax.ShapeDtypeStruct((cd, 1, tb), jnp.float32),
            jax.ShapeDtypeStruct((cd, 1, tb), jnp.float32),
        ],
        compiler_params=pltpu.CompilerParams(
            dimension_semantics=("parallel", "arbitrary"),
            vmem_limit_bytes=vmem_limit,
            allow_input_fusion=[True, True]),
    )(yh_t, yt_t)

    total_sq = jnp.sum(out_sq)
    total_cos = jnp.sum(out_cos)
    return total_sq / jnp.float32(3 * B) + 1.0 - total_cos / jnp.float32(B)


def _reference_loss(y_hat, y):
    yh = y_hat.astype(jnp.float32)
    yt = y.astype(jnp.float32)
    mse = jnp.mean((yh[:, 0:3] - yt[:, 0:3]) ** 2)
    a, b = yh[:, 3:], yt[:, 3:]
    na = jnp.maximum(jnp.linalg.norm(a, axis=1), _EPS)
    nb = jnp.maximum(jnp.linalg.norm(b, axis=1), _EPS)
    cos = jnp.sum(a * b, axis=1) / (na * nb)
    return mse + 1.0 - jnp.mean(cos)


if __name__ == "__main__":
    key = jax.random.PRNGKey(0)
    k1, k2, k3, k4 = jax.random.split(key, 4)

    # Small pose-regression shapes: batch=8, feature dim 7 (xyz + quaternion).
    B, D = 8, 7
    y_hat = jax.random.normal(k1, (B, D), dtype=jnp.float32)
    y = jax.random.normal(k2, (B, D), dtype=jnp.float32)

    # Force the Pallas path even at tiny batch so the kernel itself is exercised.
    loss = pos_and_angle_loss(y_hat, y, min_pallas_batch=0)
    jax.block_until_ready(loss)
    ref = _reference_loss(y_hat, y)
    assert jnp.allclose(loss, ref, rtol=1e-5, atol=1e-5), (loss, ref)

    # Multi-step accumulation + ragged-padding path: B=300 with a tiny tile so
    # the grid has several "arbitrary" steps plus zero-padded tail samples.
    B2 = 300
    y_hat2 = jax.random.normal(k3, (B2, D), dtype=jnp.float32)
    y2 = jax.random.normal(k4, (B2, D), dtype=jnp.float32)
    loss2 = pos_and_angle_loss(y_hat2, y2, block_b=128, min_pallas_batch=0)
    jax.block_until_ready(loss2)
    ref2 = _reference_loss(y_hat2, y2)
    assert jnp.allclose(loss2, ref2, rtol=1e-5, atol=1e-5), (loss2, ref2)

    # Default small-batch fast path (pure XLA, dispatch-latency bound regime).
    loss3 = pos_and_angle_loss(y_hat, y)
    jax.block_until_ready(loss3)
    assert jnp.allclose(loss3, ref, rtol=1e-5, atol=1e-5), (loss3, ref)

    print("KERNEL_OK")
</pallas_src>

<mosaic_0001>
module attributes {stable_mosaic.version = 11 : i64} {
  func.func @_partials_kernel(%arg0: i32, %arg1: i32, %arg2: memref<7x128xf32, #tpu.memory_space<vmem>>, %arg3: memref<7x128xf32, #tpu.memory_space<vmem>>, %arg4: memref<1x1x128xf32, #tpu.memory_space<vmem>>, %arg5: memref<1x1x128xf32, #tpu.memory_space<vmem>>) attributes {dimension_semantics = [#tpu.dimension_semantics<parallel>, #tpu.dimension_semantics<arbitrary>], iteration_bounds = array<i64: 1, 1>, scalar_prefetch = 0 : i64, scratch_operands = 0 : i64, tpu.core_type = #tpu.core_type<tc>, window_params = [{transform_indices = @transform_0, window_bounds = array<i64: 7, 128>}, {transform_indices = @transform_1, window_bounds = array<i64: 7, 128>}, {transform_indices = @transform_2, window_bounds = array<i64: 1, 1, 128>}, {transform_indices = @transform_3, window_bounds = array<i64: 1, 1, 128>}]} {
    %c0_i32 = arith.constant 0 : i32
    %0 = arith.cmpi eq, %arg1, %c0_i32 : i32
    %1 = arith.extui %0 : i1 to i32
    %c0_i32_0 = arith.constant 0 : i32
    %2 = arith.cmpi ne, %1, %c0_i32_0 : i32
    scf.if %2 {
      %cst_24 = arith.constant 0.000000e+00 : f32
      %35 = vector.broadcast %cst_24 : f32 to vector<1x1x128xf32>
      %c0_25 = arith.constant 0 : index
      %c0_26 = arith.constant 0 : index
      %c0_27 = arith.constant 0 : index
      %36 = vector.load %arg4[%c0_25, %c0_26, %c0_27] : memref<1x1x128xf32, #tpu.memory_space<vmem>>, vector<1x1x128xf32>
      tpu.vector_store %arg4[%c0_25, %c0_26, %c0_27], %35 {strides = array<i32>} : memref<1x1x128xf32, #tpu.memory_space<vmem>>, vector<1x1x128xf32>,
      %cst_28 = arith.constant 0.000000e+00 : f32
      %37 = vector.broadcast %cst_28 : f32 to vector<1x1x128xf32>
      %c0_29 = arith.constant 0 : index
      %c0_30 = arith.constant 0 : index
      %c0_31 = arith.constant 0 : index
      %38 = vector.load %arg5[%c0_29, %c0_30, %c0_31] : memref<1x1x128xf32, #tpu.memory_space<vmem>>, vector<1x1x128xf32>
      tpu.vector_store %arg5[%c0_29, %c0_30, %c0_31], %37 {strides = array<i32>} : memref<1x1x128xf32, #tpu.memory_space<vmem>>, vector<1x1x128xf32>,
    } else {
    }
    %c0 = arith.constant 0 : index
    %c0_1 = arith.constant 0 : index
    %3 = vector.load %arg2[%c0, %c0_1] : memref<7x128xf32, #tpu.memory_space<vmem>>, vector<3x128xf32>
    %c0_2 = arith.constant 0 : index
    %c0_3 = arith.constant 0 : index
    %4 = vector.load %arg3[%c0_2, %c0_3] : memref<7x128xf32, #tpu.memory_space<vmem>>, vector<3x128xf32>
    %5 = arith.subf %3, %4 : vector<3x128xf32>
    %6 = arith.mulf %5, %5 : vector<3x128xf32>
    %cst = arith.constant dense<0.000000e+00> : vector<128xf32>
    %7 = vector.multi_reduction <add>, %6, %cst [0] : vector<3x128xf32> to vector<128xf32>
    %8 = vector.shape_cast %7 : vector<128xf32> to vector<1x128xf32>
    %c3 = arith.constant 3 : index
    %c0_4 = arith.constant 0 : index
    %9 = vector.load %arg2[%c3, %c0_4] : memref<7x128xf32, #tpu.memory_space<vmem>>, vector<4x128xf32>
    %c3_5 = arith.constant 3 : index
    %c0_6 = arith.constant 0 : index
    %10 = vector.load %arg3[%c3_5, %c0_6] : memref<7x128xf32, #tpu.memory_space<vmem>>, vector<4x128xf32>
    %11 = arith.mulf %9, %10 : vector<4x128xf32>
    %cst_7 = arith.constant dense<0.000000e+00> : vector<128xf32>
    %12 = vector.multi_reduction <add>, %11, %cst_7 [0] : vector<4x128xf32> to vector<128xf32>
    %13 = vector.shape_cast %12 : vector<128xf32> to vector<1x128xf32>
    %14 = arith.mulf %9, %9 : vector<4x128xf32>
    %cst_8 = arith.constant dense<0.000000e+00> : vector<128xf32>
    %15 = vector.multi_reduction <add>, %14, %cst_8 [0] : vector<4x128xf32> to vector<128xf32>
    %16 = vector.shape_cast %15 : vector<128xf32> to vector<1x128xf32>
    %17 = arith.mulf %10, %10 : vector<4x128xf32>
    %cst_9 = arith.constant dense<0.000000e+00> : vector<128xf32>
    %18 = vector.multi_reduction <add>, %17, %cst_9 [0] : vector<4x128xf32> to vector<128xf32>
    %19 = vector.shape_cast %18 : vector<128xf32> to vector<1x128xf32>
    %cst_10 = arith.constant 1.000000e-16 : f32
    %20 = vector.broadcast %cst_10 : f32 to vector<1x128xf32>
    %21 = arith.maximumf %16, %20 : vector<1x128xf32>
    %cst_11 = arith.constant 1.000000e-16 : f32
    %22 = vector.broadcast %cst_11 : f32 to vector<1x128xf32>
    %23 = arith.maximumf %19, %22 : vector<1x128xf32>
    %24 = arith.mulf %21, %23 : vector<1x128xf32>
    %25 = math.rsqrt %24 : vector<1x128xf32>
    %26 = arith.mulf %13, %25 : vector<1x128xf32>
    %c0_12 = arith.constant 0 : index
    %c0_13 = arith.constant 0 : index
    %c0_14 = arith.constant 0 : index
    %27 = vector.load %arg4[%c0_12, %c0_13, %c0_14] : memref<1x1x128xf32, #tpu.memory_space<vmem>>, vector<1x1x128xf32>
    %28 = vector.shape_cast %8 : vector<1x128xf32> to vector<1x1x128xf32>
    %29 = arith.addf %27, %28 : vector<1x1x128xf32>
    %c0_15 = arith.constant 0 : index
    %c0_16 = arith.constant 0 : index
    %c0_17 = arith.constant 0 : index
    %30 = vector.load %arg4[%c0_15, %c0_16, %c0_17] : memref<1x1x128xf32, #tpu.memory_space<vmem>>, vector<1x1x128xf32>
    tpu.vector_store %arg4[%c0_15, %c0_16, %c0_17], %29 {strides = array<i32>} : memref<1x1x128xf32, #tpu.memory_space<vmem>>, vector<1x1x128xf32>,
    %c0_18 = arith.constant 0 : index
    %c0_19 = arith.constant 0 : index
    %c0_20 = arith.constant 0 : index
    %31 = vector.load %arg5[%c0_18, %c0_19, %c0_20] : memref<1x1x128xf32, #tpu.memory_space<vmem>>, vector<1x1x128xf32>
    %32 = vector.shape_cast %26 : vector<1x128xf32> to vector<1x1x128xf32>
    %33 = arith.addf %31, %32 : vector<1x1x128xf32>
    %c0_21 = arith.constant 0 : index
    %c0_22 = arith.constant 0 : index
    %c0_23 = arith.constant 0 : index
    %34 = vector.load %arg5[%c0_21, %c0_22, %c0_23] : memref<1x1x128xf32, #tpu.memory_space<vmem>>, vector<1x1x128xf32>
    tpu.vector_store %arg5[%c0_21, %c0_22, %c0_23], %33 {strides = array<i32>} : memref<1x1x128xf32, #tpu.memory_space<vmem>>, vector<1x1x128xf32>,
    return
  }
  func.func @transform_0(%arg0: i32, %arg1: i32) -> (i32, i32) {
    %c1_i32 = arith.constant 1 : i32
    %0 = arith.muli %arg0, %c1_i32 : i32
    %1 = arith.addi %0, %arg1 : i32
    %c0_i32 = arith.constant 0 : i32
    %c0_i32_0 = arith.constant 0 : i32
    return %c0_i32, %1 : i32, i32
  }
  func.func @transform_1(%arg0: i32, %arg1: i32) -> (i32, i32) {
    %c1_i32 = arith.constant 1 : i32
    %0 = arith.muli %arg0, %c1_i32 : i32
    %1 = arith.addi %0, %arg1 : i32
    %c0_i32 = arith.constant 0 : i32
    %c0_i32_0 = arith.constant 0 : i32
    return %c0_i32, %1 : i32, i32
  }
  func.func @transform_2(%arg0: i32, %arg1: i32) -> (i32, i32, i32) {
    %c0_i32 = arith.constant 0 : i32
    %c0_i32_0 = arith.constant 0 : i32
    %c0_i32_1 = arith.constant 0 : i32
    return %arg0, %c0_i32, %c0_i32_0 : i32, i32, i32
  }
  func.func @transform_3(%arg0: i32, %arg1: i32) -> (i32, i32, i32) {
    %c0_i32 = arith.constant 0 : i32
    %c0_i32_0 = arith.constant 0 : i32
    %c0_i32_1 = arith.constant 0 : i32
    return %arg0, %c0_i32, %c0_i32_0 : i32, i32, i32
  }
}

</mosaic_0001>

<bundles_post_ra>
// kernel: tpu_custom_call.1
= control target key start
LH: loop header
LB: loop body
LE: loop exit
PB: predicated region body
PF: predicated region fallthrough
CT: control target
= control target key end

     0   :  { %9 = vsyncpa [#allocation3], 0  ;;  %s309_s0 = inlined_call_operand.hbm [shape: f32[7,128], index: 0, kind: input, shape index: {}]   ;;  %s310_s1 = inlined_call_operand.hbm [shape: f32[7,128], index: 1, kind: input, shape index: {}]   ;;  %s311_s2 = inlined_call_operand.hbm [shape: f32[1,1,128], index: 2, kind: output, shape index: {0}]   ;;  %s312_s3 = inlined_call_operand.hbm [shape: f32[1,1,128], index: 3, kind: output, shape index: {1}]  }
   0x1   :  { %10 = vsyncpa [#allocation6], 0 }
   0x2   :  { %11 = vsyncpa [#allocation4], 0 }
   0x3   :  { %12 = vsyncpa [#allocation9], 0  ;;  %s236_s12 = smov [#allocation2]   ;;  %s237_s14 = smov [#allocation5]  }
   0x4   :  { %s22_s13 = sshll.u32 %s236_s12, 4  ;;  %s35_s15 = sshll.u32 %s237_s14, 4  ;;  %s23_s13 = int_to_ptr.vmem [resolvable:$true] %s22_s13  ;;  %s36_s15 = int_to_ptr.vmem [resolvable:$true] %s35_s15 }
   0x5   :  { %s140_s18 = scalar_lea.hbm %s309_s0, 128 }
   0x6   :  { %p141_p0 = scmp.ne.s32.totalorder %s309_s0, %s140_s18  ;;  %p144_p1 = scmp.lt.u32.totalorder %s140_s18, %s309_s0 }
   0x8   :  { %p146_p2 = pnand %p144_p1, %p141_p0 }
   0xa   :  { %149 = shalt.err (!%p146_p2)
}
   0xb   :  { %s150_s23 = scalar_lea.vmem %s23_s13, 128  ;;  %p155_p4 = scmp.lt.s32.totalorder %s23_s13, %s23_s13 }
   0xc   :  { %p151_p3 = scmp.ne.s32.totalorder %s23_s13, %s150_s23  ;;  %p156_p5 = scmp.lt.s32.totalorder %s150_s23, %s150_s23 }
   0xe   :  { %p157_p6 = por %p156_p5, %p155_p4 }
  0x10   :  { %p158_p7 = pnand %p157_p6, %p151_p3 }
  0x12   :  { %161 = shalt.err (!%p158_p7)
}
  0x13   :  { %25 = dma.hbm_to_vmem [thread:$0]  %s309_s0, 128, %s23_s13, [#allocation3]  }
  0x14   :  { %s162_s28 = scalar_lea.hbm %s310_s1, 128 }
  0x15   :  { %p163_p8 = scmp.ne.s32.totalorder %s310_s1, %s162_s28  ;;  %p166_p9 = scmp.lt.u32.totalorder %s162_s28, %s310_s1 }
  0x17   :  { %p168_p10 = pnand %p166_p9, %p163_p8 }
  0x19   :  { %171 = shalt.err (!%p168_p10)
}
  0x1a   :  { %s172_s6 = scalar_lea.vmem %s36_s15, 128  ;;  %p177_p12 = scmp.lt.s32.totalorder %s36_s15, %s36_s15 }
  0x1b   :  { %p173_p11 = scmp.ne.s32.totalorder %s36_s15, %s172_s6  ;;  %p178_p13 = scmp.lt.s32.totalorder %s172_s6, %s172_s6 }
  0x1d   :  { %p179_p0 = por %p178_p13, %p177_p12 }
  0x1f   :  { %p180_p1 = pnand %p179_p0, %p173_p11 }
  0x21   :  { %183 = shalt.err (!%p180_p1)
}
  0x22   :  { %38 = dma.hbm_to_vmem [thread:$0]  %s310_s1, 128, %s36_s15, [#allocation6]  }
  0x23   :  { %228 = dma.done.wait [#allocation3], 128  }
  0x24   :  { %229 = vsyncadd [#allocation3], 4294967168 }
  0x25   :  { %230 = dma.done.wait [#allocation6], 128  }
  0x26   :  { %231 = vsyncadd [#allocation6], 4294967168  ;;  %v238_v0 = vmov 0.0   ;;  %vm68_vm0 = vcmask 1043456   ;;  %v53_v1 = vld [vmem:[#allocation2] sm:$0x7] }
  0x27   :  { %51 = vst [vmem:[#allocation7] sm:$0x1] %v238_v0  ;;  %52 = vst [vmem:[#allocation8] sm:$0x1] %v238_v0  ;;  %v54_v2 = vld [vmem:[#allocation5] sm:$0x7] }
  0x28   :  { %v65_v3 = vld [vmem:[#allocation2 + $0x3] sm:$0xf]  ;;  %v55_v4 = vsub.f32 %v53_v1, %v54_v2  ;;  %v66_v5 = vld [vmem:[#allocation5 + $0x3] sm:$0xf]  ;;  %vm57_vm1 = vcmask 1042432   ;;  %s239_s1 = smov [#allocation7]  }
  0x29   :  { %v76_v6 = vmul.f32 %v65_v3, %v65_v3  ;;  %v67_v7 = vmul.f32 %v66_v5, %v65_v3  ;;  %v84_v8 = vmul.f32 %v66_v5, %v66_v5  ;;  %s109_s8 = sshll.u32 %s239_s1, 4  ;;  %s110_s8 = int_to_ptr.vmem [resolvable:$true] %s109_s8 }
  0x2a   :  { %v56_v9 = vmul.f32 %v55_v4, %v55_v4  ;;  %s184_s9 = scalar_lea.vmem %s110_s8, 16  ;;  %s188_s10 = scalar_lea.vmem %s110_s8, 32 }
  0x2b   :  { %v77_v10 = vsel %vm68_vm0, %v76_v6, 0.0  ;;  %v85_v12 = vsel %vm68_vm0, %v84_v8, 0.0  ;;  %v69_v14 = vsel %vm68_vm0, %v67_v7, 0.0  ;;  %p185_p2 = scmp.ne.s32.totalorder %s110_s8, %s184_s9  ;;  %p189_p3 = scmp.lt.s32.totalorder %s110_s8, %s110_s8 }
  0x2c   :  { %v78_v11 = vrot.slane %v77_v10, 4  ;;  %v58_v13 = vsel %vm57_vm1, %v56_v9, 0.0  ;;  %v86_v15 = vrot.slane %v85_v12, 4  ;;  %v70_v20 = vrot.slane %v69_v14, 4  ;;  %p190_p4 = scmp.lt.s32.totalorder %s188_s10, %s184_s9 }
  0x2d   :  { %v59_v16 = vrot.slane %v58_v13, 4 }
  0x2e   :  { %v79_v17 = vadd.f32 %v78_v11, %v77_v10  ;;  %v87_v18 = vadd.f32 %v86_v15, %v85_v12  ;;  %v71_v27 = vadd.f32 %v70_v20, %v69_v14  ;;  %v97_v32 = vld [vmem:[#allocation7] sm:$0x1]  ;;  %p191_p5 = por %p190_p4, %p189_p3 }
  0x2f   :  { %v60_v19 = vadd.f32 %v59_v16, %v58_v13 }
  0x30   :  { %v80_v21 = vrot.slane %v79_v17, 2  ;;  %v88_v22 = vrot.slane %v87_v18, 2  ;;  %v72_v35 = vrot.slane %v71_v27, 2  ;;  %p192_p6 = pnand %p191_p5, %p185_p2 }
  0x31   :  { %v61_v23 = vrot.slane %v60_v19, 2 }
  0x32   :  { %v81_v24 = vadd.f32 %v80_v21, %v79_v17  ;;  %v89_v25 = vadd.f32 %v88_v22, %v87_v18  ;;  %v73_v40 = vadd.f32 %v72_v35, %v71_v27 }
  0x33   :  { %v62_v26 = vadd.f32 %v61_v23, %v60_v19 }
  0x34   :  { %v82_v28 = vrot.slane %v81_v24, 1  ;;  %v90_v29 = vrot.slane %v89_v25, 1 }
  0x35   :  { %v63_v30 = vrot.slane %v62_v26, 1 }
  0x36   :  { %v83_v31 = vadd.f32 %v82_v28, %v81_v24  ;;  %v91_v33 = vadd.f32 %v90_v29, %v89_v25 }
  0x37   :  { %v64_v34 = vadd.f32 %v63_v30, %v62_v26 }
  0x38   :  { %v92_v36 = vmax.f32 %v83_v31, 1e-16  ;;  %v93_v37 = vmax.f32 %v91_v33, 1e-16 }
  0x39   :  { %v98_v38 = vadd.f32 %v97_v32, %v64_v34 }
  0x3a   :  { %v94_v39 = vmul.f32 %v93_v37, %v92_v36 }
  0x3b   :  { %99 = vst [vmem:[#allocation7] sm:$0x1] %v98_v38 }
  0x3c   :  { %138 = vrsqrt.f32 %v94_v39 }
  0x3d   :  { %195 = shalt.err (!%p192_p6)
}
  0x3e   :  { %s196_s13 = scalar_lea.hbm %s311_s2, 16 }
  0x3f   :  { %p197_p7 = scmp.ne.s32.totalorder %s311_s2, %s196_s13  ;;  %p200_p8 = scmp.lt.u32.totalorder %s196_s13, %s311_s2 }
  0x41   :  { %p202_p9 = pnand %p200_p8, %p197_p7 }
  0x43   :  { %205 = shalt.err (!%p202_p9)
}
  0x44   :  { %112 = dma.vmem_to_hbm [thread:$0]  %s110_s8, 16, %s311_s2, [#allocation4]   ;;  %v74_v41 = vrot.slane %v73_v40, 1  ;;  %v100_v44 = vld [vmem:[#allocation8] sm:$0x1] }
  0x45   :  { %s240_s20 = smov [#allocation8]  }
  0x46   :  { %v75_v42 = vadd.f32 %v74_v41, %v73_v40  ;;  %v139_v43 = vpop.eup %138  ;;  %s119_s21 = sshll.u32 %s240_s20, 4  ;;  %s120_s21 = int_to_ptr.vmem [resolvable:$true] %s119_s21 }
  0x47   :  { %s206_s22 = scalar_lea.vmem %s120_s21, 16  ;;  %s210_s23 = scalar_lea.vmem %s120_s21, 32 }
  0x48   :  { %v96_v45 = vmul.f32 %v139_v43, %v75_v42  ;;  %p207_p10 = scmp.ne.s32.totalorder %s120_s21, %s206_s22  ;;  %p211_p11 = scmp.lt.s32.totalorder %s120_s21, %s120_s21 }
  0x49   :  { %p212_p12 = scmp.lt.s32.totalorder %s210_s23, %s206_s22 }
  0x4a   :  { %v101_v46 = vadd.f32 %v100_v44, %v96_v45 }
  0x4b   :  { %p213_p13 = por %p212_p12, %p211_p11 }
  0x4c   :  { %102 = vst [vmem:[#allocation8] sm:$0x1] %v101_v46 }
  0x4d   :  { %p214_p0 = pnand %p213_p13, %p207_p10 }
  0x4f   :  { %217 = shalt.err (!%p214_p0)
}
  0x50   :  { %s218_s25 = scalar_lea.hbm %s312_s3, 16 }
  0x51   :  { %p219_p1 = scmp.ne.s32.totalorder %s312_s3, %s218_s25  ;;  %p222_p2 = scmp.lt.u32.totalorder %s218_s25, %s312_s3 }
  0x53   :  { %p224_p3 = pnand %p222_p2, %p219_p1 }
  0x55   :  { %227 = shalt.err (!%p224_p3)
}
  0x56   :  { %122 = dma.vmem_to_hbm [thread:$0]  %s120_s21, 16, %s312_s3, [#allocation9]  }
  0x57   :  { %232 = dma.done.wait [#allocation4], 16  }
  0x58   :  { %233 = vsyncadd [#allocation4], 4294967280 }
  0x59   :  { %234 = dma.done.wait [#allocation9], 16  }
  0x5a   :  { %235 = vsyncadd [#allocation9], 4294967280 }
  0x5b   :  { %129 = vsyncpa [#allocation3], 1 }
  0x5c   :  { %130 = vsyncpa [#allocation6], 1 }
  0x5d   :  { %131 = vsyncpa [#allocation4], 1 }
  0x5e   :  { %132 = vsyncpa [#allocation9], 1 }

</bundles_post_ra>
